<compile_context>
chip_gen: v7x
topology: tpu7x:2x2x1
jax: 0.10.0
libtpu: 0.0.40
codegen_flags: <defaults>
</compile_context>

<pallas_src>
import functools
import math

import jax
import jax.numpy as jnp
from jax.experimental import pallas as pl
from jax.experimental.pallas import tpu as pltpu

D_EMBED = 64          # matches the module's d_embed
VOCAB_SIZE = 512      # synthetic small vocab (real module uses BERT's 30522)


def _embed_kernel(ids_ref, tab_ref, out_ref, *, scale):
    # ids_ref: VMEM (T, 1) int32 token ids for this tile
    # tab_ref: VMEM (V, d_embed) full embedding table (resident across the grid)
    # out_ref: VMEM (T, d_embed) output tile
    ids = ids_ref[...]                                       # (T, 1)
    T = out_ref.shape[0]
    V = tab_ref.shape[0]
    vocab_iota = jax.lax.broadcasted_iota(jnp.int32, (T, V), 1)
    # One-hot selection matrix with sqrt(d_embed) folded in (no separate VPU mul).
    p = jnp.where(vocab_iota == ids, scale, 0.0).astype(jnp.float32)  # (T, V)
    out_ref[...] = jnp.dot(
        p, tab_ref[...], preferred_element_type=jnp.float32
    ).astype(out_ref.dtype)


def input_embeddings(x, emb_table, tile_tokens=256):
    """x: (B, S) integer token ids -> (B, S, d_embed) float32,
    matching nn.Embedding(vocab, d)(x) * sqrt(d)."""
    B, S = x.shape
    V, d_embed = emb_table.shape
    N = B * S
    scale = float(math.sqrt(d_embed))

    # Token tile size: multiple of 8 (sublane-full output tiles); shrink for tiny N.
    T = min(tile_tokens, max(8, ((N + 7) // 8) * 8))
    n_tiles = (N + T - 1) // T
    N_pad = n_tiles * T

    ids = x.reshape(N).astype(jnp.int32)
    ids = jnp.pad(ids, (0, N_pad - N))            # padded rows are sliced off below
    ids = ids.reshape(N_pad, 1)                   # ids along sublanes for the one-hot

    kernel = functools.partial(_embed_kernel, scale=scale)

    out_flat = pl.pallas_call(
        kernel,
        out_shape=jax.ShapeDtypeStruct((N_pad, d_embed), emb_table.dtype),
        grid_spec=pltpu.PrefetchScalarGridSpec(
            num_scalar_prefetch=0,
            grid=(n_tiles,),
            in_specs=[
                # (T, 1) tile of token ids per grid step
                pl.BlockSpec((T, 1), lambda i: (i, 0)),
                # full embedding table, VMEM-resident (constant block index)
                pl.BlockSpec((V, d_embed), lambda i: (0, 0)),
            ],
            out_specs=pl.BlockSpec((T, d_embed), lambda i: (i, 0)),
        ),
        compiler_params=pltpu.CompilerParams(
            dimension_semantics=("parallel",)),   # independent token tiles
    )(ids, emb_table)

    return out_flat[:N].reshape(B, S, d_embed)


if __name__ == "__main__":
    key = jax.random.PRNGKey(0)
    k_ids, k_emb = jax.random.split(key)

    B, S = 2, 8
    x = jax.random.randint(k_ids, (B, S), 0, VOCAB_SIZE, dtype=jnp.int32)

    # nn.Embedding default init: weight ~ N(0, 1), shape (vocab_size, d_embed)
    emb_table = jax.random.normal(k_emb, (VOCAB_SIZE, D_EMBED), dtype=jnp.float32)

    out = input_embeddings(x, emb_table)
    out = jax.block_until_ready(out)

    # pure-JAX reference: embedding lookup * sqrt(d_embed)
    ref = emb_table[x] * math.sqrt(D_EMBED)
    assert out.shape == (B, S, D_EMBED)
    assert out.dtype == jnp.float32
    assert jnp.allclose(out, ref, atol=1e-5, rtol=1e-5)

    print("KERNEL_OK")
</pallas_src>

<mosaic_0001>
module attributes {stable_mosaic.version = 11 : i64} {
  func.func @_embed_kernel(%arg0: i32, %arg1: memref<16x1xi32, #tpu.memory_space<vmem>>, %arg2: memref<512x64xf32, #tpu.memory_space<vmem>>, %arg3: memref<16x64xf32, #tpu.memory_space<vmem>>) attributes {dimension_semantics = [#tpu.dimension_semantics<parallel>], iteration_bounds = array<i64: 1>, scalar_prefetch = 0 : i64, scratch_operands = 0 : i64, tpu.core_type = #tpu.core_type<tc>, window_params = [{transform_indices = @transform_0, window_bounds = array<i64: 16, 1>}, {pipeline_mode = #tpu.pipeline_mode<synchronous>, transform_indices = @transform_1, window_bounds = array<i64: 512, 64>}, {transform_indices = @transform_2, window_bounds = array<i64: 16, 64>}]} {
    %c0 = arith.constant 0 : index
    %c0_0 = arith.constant 0 : index
    %0 = vector.load %arg1[%c0, %c0_0] : memref<16x1xi32, #tpu.memory_space<vmem>>, vector<16x1xi32>
    %1 = tpu.iota {dimensions = array<i32: 1>} : vector<16x512xi32>
    %2 = vector.broadcast %0 : vector<16x1xi32> to vector<16x512xi32>
    %3 = arith.cmpi eq, %1, %2 : vector<16x512xi32>
    %cst = arith.constant 8.000000e+00 : f32
    %cst_1 = arith.constant 0.000000e+00 : f32
    %4 = vector.broadcast %cst : f32 to vector<16x512xf32>
    %5 = vector.broadcast %cst_1 : f32 to vector<16x512xf32>
    %6 = arith.select %3, %4, %5 : vector<16x512xi1>, vector<16x512xf32>
    %c0_2 = arith.constant 0 : index
    %c0_3 = arith.constant 0 : index
    %7 = vector.load %arg2[%c0_2, %c0_3] : memref<512x64xf32, #tpu.memory_space<vmem>>, vector<512x64xf32>
    %cst_4 = arith.constant dense<0.000000e+00> : vector<16x64xf32>
    %8 = tpu.matmul %6, %7, %cst_4 {dimension_numbers = #tpu.dot_dimension_numbers<[1], [0], [0], [1], [0, 0, 1, 1], [], []>} : vector<16x512xf32>, vector<512x64xf32>, vector<16x64xf32> -> vector<16x64xf32>
    %c0_5 = arith.constant 0 : index
    %c0_6 = arith.constant 0 : index
    %9 = vector.load %arg3[%c0_5, %c0_6] : memref<16x64xf32, #tpu.memory_space<vmem>>, vector<16x64xf32>
    tpu.vector_store %arg3[%c0_5, %c0_6], %8 {strides = array<i32>} : memref<16x64xf32, #tpu.memory_space<vmem>>, vector<16x64xf32>,
    return
  }
  func.func @transform_0(%arg0: i32) -> (i32, i32) {
    %c0_i32 = arith.constant 0 : i32
    %c0_i32_0 = arith.constant 0 : i32
    return %arg0, %c0_i32 : i32, i32
  }
  func.func @transform_1(%arg0: i32) -> (i32, i32) {
    %c0_i32 = arith.constant 0 : i32
    %c0_i32_0 = arith.constant 0 : i32
    %c0_i32_1 = arith.constant 0 : i32
    return %c0_i32, %c0_i32_0 : i32, i32
  }
  func.func @transform_2(%arg0: i32) -> (i32, i32) {
    %c0_i32 = arith.constant 0 : i32
    %c0_i32_0 = arith.constant 0 : i32
    return %arg0, %c0_i32 : i32, i32
  }
}

</mosaic_0001>

<bundles_post_ra>
// kernel: tpu_custom_call.1
= control target key start
LH: loop header
LB: loop body
LE: loop exit
PB: predicated region body
PF: predicated region fallthrough
CT: control target
= control target key end

     0   :  { %v452_v2 = vmov 0   ;;  %s682_s0 = inlined_call_operand.vmem [shape: s32[16,1], index: 0, kind: input, shape index: {}]   ;;  %s683_s1 = inlined_call_operand.vmem [shape: f32[512,64], index: 1, kind: input, shape index: {}]   ;;  %s684_s2 = inlined_call_operand.hbm [shape: f32[16,64], index: 2, kind: output, shape index: {}]  }
   0x1   :  { %v12_v0 = vld [vmem:[%s682_s0] sm:$0xff]  ;;  %427 = vset.pattern.permute.xlu0 %v452_v2  ;;  %v13_v3 = vld [vmem:[%s682_s0 + $0x8] sm:$0xff]  ;;  %v59_v14 = vld [vmem:[%s683_s1 + $0x90] sm:$0xff] }
   0x2   :  { %v57_v1 = vld [vmem:[%s683_s1 + $0x80] sm:$0xff]  ;;  %v58_v4 = vld [vmem:[%s683_s1 + $0x88] sm:$0xff]  ;;  %20 = vperm.xlu0 %427, %v12_v0   ;;  %v60_v15 = vld [vmem:[%s683_s1 + $0x98] sm:$0xff] }
   0x3   :  { %v89_v5 = vld [vmem:[%s683_s1 + $0x180] sm:$0xff]  ;;  %v90_v6 = vld [vmem:[%s683_s1 + $0x188] sm:$0xff]  ;;  %v358_v7 = vpack.c.bf16 %v58_v4, %v57_v1  ;;  %v362_v17 = vpack.c.bf16 %v60_v15, %v59_v14  ;;  %v91_v18 = vld [vmem:[%s683_s1 + $0x190] sm:$0xff] }
   0x4   :  { %v390_v8 = vpack.c.bf16 %v90_v6, %v89_v5  ;;  %v41_v9 = vld [vmem:[%s683_s1] sm:$0xff]  ;;  %v42_v10 = vld [vmem:[%s683_s1 + $0x8] sm:$0xff]  ;;  %v92_v19 = vld [vmem:[%s683_s1 + $0x198] sm:$0xff] }
   0x5   :  { %v73_v11 = vld [vmem:[%s683_s1 + $0x100] sm:$0xff]  ;;  %v360_v12 = vpack.c.bf16 %v42_v10, %v41_v9  ;;  %v74_v13 = vld [vmem:[%s683_s1 + $0x108] sm:$0xff]  ;;  %359 = vmatprep.subr.bf16.mxu0 %v358_v7  ;;  %v43_v20 = vld [vmem:[%s683_s1 + $0x10] sm:$0xff]  ;;  %v394_v21 = vpack.c.bf16 %v92_v19, %v91_v18 }
   0x6   :  { %391 = vmatprep.subr.bf16.mxu1 %v390_v8  ;;  %v392_v16 = vpack.c.bf16 %v74_v13, %v73_v11  ;;  %v44_v22 = vld [vmem:[%s683_s1 + $0x18] sm:$0xff]  ;;  %v75_v23 = vld [vmem:[%s683_s1 + $0x110] sm:$0xff]  ;;  %23 = vperm.xlu0 %427, %v13_v3   ;;  %v61_v27 = vld [vmem:[%s683_s1 + $0xa0] sm:$0xff] }
   0x7   :  { %361 = vmatpush3.bf16.msra.mxu0 %v360_v12  ;;  %v76_v24 = vld [vmem:[%s683_s1 + $0x118] sm:$0xff]  ;;  %v364_v25 = vpack.c.bf16 %v44_v22, %v43_v20  ;;  %v62_v28 = vld [vmem:[%s683_s1 + $0xa8] sm:$0xff]  ;;  %v93_v29 = vld [vmem:[%s683_s1 + $0x1a0] sm:$0xff] }
   0x8   :  { %393 = vmatpush3.bf16.msra.mxu1 %v392_v16  ;;  %v396_v26 = vpack.c.bf16 %v76_v24, %v75_v23  ;;  %363 = vmatprep.subr.bf16.mxu0 %v362_v17  ;;  %v366_v30 = vpack.c.bf16 %v62_v28, %v61_v27  ;;  %v94_v31 = vld [vmem:[%s683_s1 + $0x1a8] sm:$0xff]  ;;  %v45_v32 = vld [vmem:[%s683_s1 + $0x20] sm:$0xff]  ;;  %v63_v37 = vld [vmem:[%s683_s1 + $0xb0] sm:$0xff] }
   0x9   :  { %395 = vmatprep.subr.bf16.mxu1 %v394_v21  ;;  %v46_v33 = vld [vmem:[%s683_s1 + $0x28] sm:$0xff]  ;;  %v398_v34 = vpack.c.bf16 %v94_v31, %v93_v29  ;;  %v77_v35 = vld [vmem:[%s683_s1 + $0x120] sm:$0xff]  ;;  %v64_v39 = vld [vmem:[%s683_s1 + $0xb8] sm:$0xff] }
   0xa   :  { %v78_v36 = vld [vmem:[%s683_s1 + $0x128] sm:$0xff]  ;;  %v368_v38 = vpack.c.bf16 %v46_v33, %v45_v32  ;;  %v95_v40 = vld [vmem:[%s683_s1 + $0x1b0] sm:$0xff]  ;;  %v96_v41 = vld [vmem:[%s683_s1 + $0x1b8] sm:$0xff]  ;;  %v370_v43 = vpack.c.bf16 %v64_v39, %v63_v37 }
   0xb   :  { %365 = vmatpush3.bf16.msra.mxu0 %v364_v25  ;;  %v400_v42 = vpack.c.bf16 %v78_v36, %v77_v35  ;;  %v47_v44 = vld [vmem:[%s683_s1 + $0x30] sm:$0xff]  ;;  %v48_v45 = vld [vmem:[%s683_s1 + $0x38] sm:$0xff]  ;;  %v402_v47 = vpack.c.bf16 %v96_v41, %v95_v40  ;;  %v65_v49 = vld [vmem:[%s683_s1 + $0xc0] sm:$0xff] }
   0xc   :  { %397 = vmatpush3.bf16.msra.mxu1 %v396_v26  ;;  %367 = vmatprep.subr.bf16.mxu0 %v366_v30  ;;  %v79_v46 = vld [vmem:[%s683_s1 + $0x130] sm:$0xff]  ;;  %v80_v48 = vld [vmem:[%s683_s1 + $0x138] sm:$0xff]  ;;  %v66_v50 = vld [vmem:[%s683_s1 + $0xc8] sm:$0xff]  ;;  %v372_v53 = vpack.c.bf16 %v48_v45, %v47_v44 }
   0xd   :  { %399 = vmatprep.subr.bf16.mxu1 %v398_v34  ;;  %v97_v51 = vld [vmem:[%s683_s1 + $0x1c0] sm:$0xff]  ;;  %v98_v52 = vld [vmem:[%s683_s1 + $0x1c8] sm:$0xff]  ;;  %v404_v54 = vpack.c.bf16 %v80_v48, %v79_v46  ;;  %v374_v55 = vpack.c.bf16 %v66_v50, %v65_v49  ;;  %v67_v61 = vld [vmem:[%s683_s1 + $0xd0] sm:$0xff] }
   0xe   :  { %v49_v56 = vld [vmem:[%s683_s1 + $0x40] sm:$0xff]  ;;  %v50_v57 = vld [vmem:[%s683_s1 + $0x48] sm:$0xff]  ;;  %v406_v59 = vpack.c.bf16 %v98_v52, %v97_v51  ;;  %v68_v62 = vld [vmem:[%s683_s1 + $0xd8] sm:$0xff] }
   0xf   :  { %369 = vmatpush3.bf16.msra.mxu0 %v368_v38  ;;  %v81_v58 = vld [vmem:[%s683_s1 + $0x140] sm:$0xff]  ;;  %v82_v60 = vld [vmem:[%s683_s1 + $0x148] sm:$0xff]  ;;  %v99_v63 = vld [vmem:[%s683_s1 + $0x1d0] sm:$0xff]  ;;  %v376_v1 = vpack.c.bf16 %v50_v57, %v49_v56  ;;  %v378_v3 = vpack.c.bf16 %v68_v62, %v67_v61 }
  0x10   :  { %401 = vmatpush3.bf16.msra.mxu1 %v400_v42  ;;  %371 = vmatprep.subr.bf16.mxu0 %v370_v43  ;;  %v100_v0 = vld [vmem:[%s683_s1 + $0x1d8] sm:$0xff]  ;;  %v408_v2 = vpack.c.bf16 %v82_v60, %v81_v58  ;;  %v51_v4 = vld [vmem:[%s683_s1 + $0x50] sm:$0xff]  ;;  %v69_v9 = vld [vmem:[%s683_s1 + $0xe0] sm:$0xff] }
  0x11   :  { %403 = vmatprep.subr.bf16.mxu1 %v402_v47  ;;  %v52_v5 = vld [vmem:[%s683_s1 + $0x58] sm:$0xff]  ;;  %v83_v6 = vld [vmem:[%s683_s1 + $0x150] sm:$0xff]  ;;  %v410_v7 = vpack.c.bf16 %v100_v0, %v99_v63  ;;  %v70_v10 = vld [vmem:[%s683_s1 + $0xe8] sm:$0xff] }
  0x12   :  { %v84_v8 = vld [vmem:[%s683_s1 + $0x158] sm:$0xff]  ;;  %v101_v11 = vld [vmem:[%s683_s1 + $0x1e0] sm:$0xff]  ;;  %v102_v12 = vld [vmem:[%s683_s1 + $0x1e8] sm:$0xff]  ;;  %v380_v13 = vpack.c.bf16 %v52_v5, %v51_v4  ;;  %v382_v16 = vpack.c.bf16 %v70_v10, %v69_v9 }
  0x13   :  { %373 = vmatpush3.bf16.msra.mxu0 %v372_v53  ;;  %v53_v14 = vld [vmem:[%s683_s1 + $0x60] sm:$0xff]  ;;  %v412_v15 = vpack.c.bf16 %v84_v8, %v83_v6  ;;  %v54_v17 = vld [vmem:[%s683_s1 + $0x68] sm:$0xff] }
  0x14   :  { %405 = vmatpush3.bf16.msra.mxu1 %v404_v54  ;;  %375 = vmatprep.subr.bf16.mxu0 %v374_v55  ;;  %v85_v18 = vld [vmem:[%s683_s1 + $0x160] sm:$0xff] }
  0x15   :  { %407 = vmatprep.subr.bf16.mxu1 %v406_v59 }
  0x17   :  { %377 = vmatpush3.bf16.msra.mxu0 %v376_v1 }
  0x18   :  { %409 = vmatpush3.bf16.msra.mxu1 %v408_v2  ;;  %379 = vmatprep.subr.bf16.mxu0 %v378_v3 }
  0x19   :  { %7 = vsyncpa [#allocation3], 0  ;;  %411 = vmatprep.subr.bf16.mxu1 %v410_v7  ;;  %v414_v19 = vpack.c.bf16 %v102_v12, %v101_v11  ;;  %v86_v20 = vld [vmem:[%s683_s1 + $0x168] sm:$0xff]  ;;  %v71_v21 = vld [vmem:[%s683_s1 + $0xf0] sm:$0xff]  ;;  %v384_v25 = vpack.c.bf16 %v54_v17, %v53_v14  ;;  %v14_v35 = vlaneseq  ;;  %v453_v41 = vmov 8.0  }
  0x1a   :  { %v72_v22 = vld [vmem:[%s683_s1 + $0xf8] sm:$0xff]  ;;  %v103_v23 = vld [vmem:[%s683_s1 + $0x1f0] sm:$0xff]  ;;  %v416_v26 = vpack.c.bf16 %v86_v20, %v85_v18  ;;  %vm255_vm8 = vcmask 523264  }
  0x1b   :  { %v104_v24 = vld [vmem:[%s683_s1 + $0x1f8] sm:$0xff]  ;;  %381 = vmatpush3.bf16.msra.mxu0 %v380_v13  ;;  %v386_v27 = vpack.c.bf16 %v72_v22, %v71_v21  ;;  %v55_v28 = vld [vmem:[%s683_s1 + $0x70] sm:$0xff]  ;;  %v15_v36 = vand.u32 127, %v14_v35 }
  0x1c   :  { %413 = vmatpush3.bf16.msra.mxu1 %v412_v15  ;;  %383 = vmatprep.subr.bf16.mxu0 %v382_v16  ;;  %v56_v29 = vld [vmem:[%s683_s1 + $0x78] sm:$0xff]  ;;  %v418_v30 = vpack.c.bf16 %v104_v24, %v103_v23  ;;  %v87_v31 = vld [vmem:[%s683_s1 + $0x170] sm:$0xff] }
  0x1d   :  { %415 = vmatprep.subr.bf16.mxu1 %v414_v19  ;;  %v88_v32 = vld [vmem:[%s683_s1 + $0x178] sm:$0xff]  ;;  %v388_v33 = vpack.c.bf16 %v56_v29, %v55_v28  ;;  %v16_v37 = vadd.s32 128, %v15_v36  ;;  %v18_v38 = vadd.s32 384, %v15_v36  ;;  %v17_v39 = vadd.s32 256, %v15_v36  ;;  %s454_s1 = smov [#allocation2]  }
  0x1e   :  { %v420_v34 = vpack.c.bf16 %v88_v32, %v87_v31  ;;  %s263_s24 = sshll.u32 %s454_s1, 4  ;;  %s264_s24 = int_to_ptr.vmem [resolvable:$true] %s263_s24 }
  0x1f   :  { %385 = vmatpush3.bf16.msra.mxu0 %v384_v25  ;;  %s428_s25 = scalar_lea.vmem %s264_s24, 256  ;;  %p433_p1 = scmp.lt.s32.totalorder %s264_s24, %s264_s24 }
  0x20   :  { %417 = vmatpush3.bf16.msra.mxu1 %v416_v26  ;;  %387 = vmatprep.subr.bf16.mxu0 %v386_v27  ;;  %p429_p0 = scmp.ne.s32.totalorder %s264_s24, %s428_s25  ;;  %p434_p2 = scmp.lt.s32.totalorder %s428_s25, %s428_s25 }
  0x21   :  { %419 = vmatprep.subr.bf16.mxu1 %v418_v30 }
  0x22   :  { %p435_p3 = por %p434_p2, %p433_p1 }
  0x23   :  { %389 = vmatpush3.bf16.msra.mxu0 %v388_v33 }
  0x24   :  { %421 = vmatpush3.bf16.msra.mxu1 %v420_v34  ;;  %p436_p4 = pnand %p435_p3, %p429_p0 }
  0x81   :  { %v21_v40 = vpop.permute.xlu0 %20 }
  0x82   :  { %vm26_vm0 = vcmp.eq.s32.totalorder %v16_v37, %v21_v40  ;;  %vm28_vm1 = vcmp.eq.s32.totalorder %v18_v38, %v21_v40  ;;  %vm25_vm2 = vcmp.eq.s32.totalorder %v15_v36, %v21_v40  ;;  %vm27_vm3 = vcmp.eq.s32.totalorder %v17_v39, %v21_v40 }
  0x83   :  { %274 = vmatprep.mubr.msk.f32.mxu0 %vm26_vm0, %v453_v41  ;;  %278 = vmatprep.mubr.msk.f32.mxu1 %vm28_vm1, %v453_v41 }
  0x84   :  { %275 = vmatmul.mubr.msk.f32.vlgmr.msra.gmra.mrb[0].mxu0 %vm25_vm2, %v453_v41  ;;  %279 = vmatmul.mubr.msk.f32.vlgmr.msra.gmra.mrb[0].mxu1 %vm27_vm3, %v453_v41 }
  0x85   :  { %v24_v42 = vpop.permute.xlu0 %23 }
  0x86   :  { %vm30_vm4 = vcmp.eq.s32.totalorder %v16_v37, %v24_v42  ;;  %vm32_vm5 = vcmp.eq.s32.totalorder %v18_v38, %v24_v42  ;;  %vm29_vm6 = vcmp.eq.s32.totalorder %v15_v36, %v24_v42  ;;  %vm31_vm7 = vcmp.eq.s32.totalorder %v17_v39, %v24_v42 }
  0x87   :  { %276 = vmatprep.mubr.msk.f32.mxu0 %vm30_vm4, %v453_v41  ;;  %280 = vmatprep.mubr.msk.f32.mxu1 %vm32_vm5, %v453_v41 }
  0x88   :  { %277 = vmatmul.mubr.msk.f32.gmra.mrb[2].mxu0 %vm29_vm6, %v453_v41  ;;  %281 = vmatmul.mubr.msk.f32.gmra.mrb[2].mxu1 %vm31_vm7, %v453_v41 }
 0x157   :  { %v314_v43 = vpop.f32.mrb[0].mxu0  ;;  %v352_v44 = vpop.f32.mrb[0].mxu1 }
 0x158   :  { %v315_v45 = vpop.f32.mrb[1].mxu0  ;;  %v353_v46 = vpop.f32.mrb[1].mxu1 }
 0x159   :  { %v316_v47 = vadd.f32 %v315_v45, %v314_v43  ;;  %v354_v48 = vadd.f32 %v353_v46, %v352_v44 }
 0x15b   :  { %v247_v49 = vadd.f32 %v354_v48, %v316_v47  ;;  %v317_v50 = vpop.f32.mrb[2].mxu0  ;;  %v355_v51 = vpop.f32.mrb[2].mxu1 }
 0x15c   :  { %v318_v52 = vpop.f32.mrb[3].mxu0  ;;  %v356_v53 = vpop.f32.mrb[3].mxu1 }
 0x15d   :  { %256 = vst.msk [vmem:[#allocation2] sm:$0xff] %vm255_vm8, %v247_v49  ;;  %v319_v54 = vadd.f32 %v318_v52, %v317_v50  ;;  %v357_v55 = vadd.f32 %v356_v53, %v355_v51 }
 0x15f   :  { %v252_v56 = vadd.f32 %v357_v55, %v319_v54 }
 0x161   :  { %257 = vst.msk [vmem:[#allocation2 + $0x8] sm:$0xff] %vm255_vm8, %v252_v56 }
 0x162   :  { %439 = shalt.err (!%p436_p4)
}
 0x163   :  { %s440_s28 = scalar_lea.hbm %s684_s2, 256 }
 0x164   :  { %p441_p5 = scmp.ne.s32.totalorder %s684_s2, %s440_s28  ;;  %p444_p6 = scmp.lt.u32.totalorder %s440_s28, %s684_s2 }
 0x166   :  { %p446_p7 = pnand %p444_p6, %p441_p5 }
 0x168   :  { %449 = shalt.err (!%p446_p7)
}
 0x169   :  { %s455_s5 = smov 128   ;;  %s456_s6 = smov 8  }
 0x16a   :  { %269 = dma.vmem_to_hbm [thread:$0]  %s264_s24, 256, %s684_s2, [#allocation3], %s455_s5, %s455_s5, %s456_s6  }
 0x16b   :  { %450 = dma.done.wait [#allocation3], 256  }
 0x16c   :  { %451 = vsyncadd [#allocation3], 4294967040 }
 0x16d   :  { %273 = vsyncpa [#allocation3], 1 }

</bundles_post_ra>
